<compile_context>
chip_gen: v7x
topology: tpu7x:2x2x1
jax: 0.10.0
libtpu: 0.0.40
codegen_flags: <defaults>
</compile_context>

<pallas_src>
import jax
import jax.numpy as jnp
from jax.experimental import pallas as pl
from jax.experimental.pallas import tpu as pltpu

# ----------------------------- problem sizes --------------------------------
N = 16        # graph nodes (supply-chain sites)
F = 8         # input node-feature dim
H = 32        # hidden dim of actor/critic GNNs
E = 40        # edges per graph (synthetic)
LANES = 128   # lane-dense packed width for weights / output slabs
GRAPHS_PER_STEP = 8   # G: graphs batched per grid step -> M = G*N = 128 MXU rows


# ------------------------------- kernel -------------------------------------
def a2c_kernel(adj_ref, xw1_ref, wh_ref, b_ref, pool_ref, slab_ref, val_ref):
    # adj_ref : [GN, GN]  bf16  block-diagonal adjacency over the G graphs of this step
    # xw1_ref : [GN, 128] bf16  x @ W1 (cols 0:H actor hidden, H:2H critic hidden)
    # wh_ref  : [128,128] bf16  packed head weights (col0=mu, col1=sigma_pre, col2=v)
    # b_ref   : [2, 128]  f32   row0 = hidden biases, row1 = head biases
    # pool_ref: [G, GN]   f32   segment-pooling matrix (ones over each graph's rows)
    b_hidden = b_ref[0:1, :]                                           # [1,128]
    b_head = b_ref[1:2, :]                                             # [1,128]

    # message passing + hidden layer fused into one MXU op: adj @ (x @ W1)
    agg = jnp.dot(adj_ref[...], xw1_ref[...],
                  preferred_element_type=jnp.float32)                  # [GN,128] f32
    h = jnp.maximum(agg + b_hidden, 0.0)                               # f32 elementwise

    # fused actor+critic heads: col0 = mu, col1 = sigma_pre, col2 = v_node
    pre = jnp.dot(h.astype(jnp.bfloat16), wh_ref[...],
                  preferred_element_type=jnp.float32) + b_head         # [GN,128] f32

    # softplus only on the narrow sigma column, spliced back via a lane select
    sig = jnp.logaddexp(pre[:, 1:2], 0.0)                              # [GN,1]
    col = jax.lax.broadcasted_iota(jnp.int32, pre.shape, 1)            # [GN,128]
    slab_ref[...] = jnp.where(col == 1, sig, pre)                      # col0=mu, col1=sigma
    # NOTE: lanes 3..127 hold raw head pre-activations (zero with zero-padded
    # WH / biases); consumers must only read cols 0 and 1.

    # critic global-sum pooling per graph via the tiny [G,GN] segment matrix.
    # Only column 2 of val_ref is meaningful (other lanes are sums of raw
    # pre-activations); consumers must read val[..., 2].
    val_ref[...] = jnp.dot(pool_ref[...], pre,
                           preferred_element_type=jnp.float32)         # [G,128]


# ------------------------------- wrapper -------------------------------------
def a2c_forward(adj, x, packed, *, graphs_per_step=GRAPHS_PER_STEP):
    """Batched actor+critic forward.

    adj   : [B, N, N] f32 row-normalized weighted adjacency (with self loops)
    x     : [B, N, F] f32 node features
    packed: (W1 [F,128], WH [128,128], B [2,128]) f32 packed parameters

    Returns lane-dense slabs (read columns directly downstream):
      slab [B, N, 128] f32 : col0 = mu, col1 = sigma (per node)
      vals [B, 128]    f32 : col2 = critic value (global sum pool per graph)
    """
    w1, wh, b = packed
    bsz = adj.shape[0]
    g = graphs_per_step
    nsteps = -(-bsz // g)          # cdiv
    bpad = nsteps * g
    gn = g * N

    # Fold x @ W1 into the wrapper:  adj @ (x @ W1) == (adj @ x) @ W1
    xw1 = jnp.einsum('bnf,fl->bnl', x, w1)                      # [B,N,128] f32

    # pad batch with zero graphs up to a multiple of g (dropped on return)
    if bpad != bsz:
        adj = jnp.pad(adj, ((0, bpad - bsz), (0, 0), (0, 0)))
        xw1 = jnp.pad(xw1, ((0, bpad - bsz), (0, 0), (0, 0)))

    # block-diagonal adjacency over each group of g graphs (bf16 MXU operand)
    adj_g = adj.reshape(nsteps, g, N, N)
    eye_g = jnp.eye(g, dtype=jnp.float32)
    adj_bd = jnp.einsum('sgij,gh->sgihj', adj_g, eye_g).reshape(nsteps, gn, gn)
    adj_bd = adj_bd.astype(jnp.bfloat16)
    xw1_s = xw1.reshape(nsteps, gn, LANES).astype(jnp.bfloat16)
    wh_bf = wh.astype(jnp.bfloat16)

    # segment-pooling matrix: row r has ones over the N rows of graph r
    pool = jnp.repeat(eye_g, N, axis=1)                          # [g, gn] f32

    flops = nsteps * (2 * gn * gn * LANES + 2 * gn * LANES * LANES
                      + 2 * g * gn * LANES)
    bytes_accessed = (adj_bd.size * 2 + xw1_s.size * 2 + wh_bf.size * 2
                      + b.size * 4 + pool.size * 4
                      + nsteps * (gn * LANES + g * LANES) * 4)
    cost = pl.CostEstimate(flops=flops,
                           transcendentals=nsteps * gn * 2,
                           bytes_accessed=bytes_accessed)

    # megacore split only pays off once there are many steps per core
    semantics = ("parallel",) if nsteps >= 8 else ("arbitrary",)

    slab, vals = pl.pallas_call(
        a2c_kernel,
        out_shape=(jax.ShapeDtypeStruct((nsteps, gn, LANES), jnp.float32),
                   jax.ShapeDtypeStruct((nsteps, g, LANES), jnp.float32)),
        grid=(nsteps,),
        in_specs=[
            pl.BlockSpec((None, gn, gn), lambda i: (i, 0, 0)),     # block-diag adj
            pl.BlockSpec((None, gn, LANES), lambda i: (i, 0, 0)),  # x @ W1
            pl.BlockSpec((LANES, LANES), lambda i: (0, 0)),        # packed head W
            pl.BlockSpec((2, LANES), lambda i: (0, 0)),            # packed biases
            pl.BlockSpec((g, gn), lambda i: (0, 0)),               # pooling matrix
        ],
        out_specs=(
            pl.BlockSpec((None, gn, LANES), lambda i: (i, 0, 0)),
            pl.BlockSpec((None, g, LANES), lambda i: (i, 0, 0)),
        ),
        compiler_params=pltpu.CompilerParams(dimension_semantics=semantics),
        cost_estimate=cost,
    )(adj_bd, xw1_s, wh_bf, b, pool)

    slab = slab.reshape(bpad, N, LANES)[:bsz]
    vals = vals.reshape(bpad, LANES)[:bsz]
    return slab, vals


def unpack_outputs(slab, vals):
    """Convenience split (test glue). Hot-path consumers should read the slabs
    directly (slab col0=mu, col1=sigma; vals col2=value)."""
    mu = slab[:, :, 0:1]                       # [B, N, 1]
    sigma = slab[:, :, 1:2]                    # [B, N, 1]
    value = vals[:, 2].reshape(-1, 1, 1)       # [B, 1, 1]
    return mu, sigma, value


# ---------------------- parameter packing (plain JAX glue) -------------------
def pack_params(params):
    (w1a, b1a, wmu, bmu, wsig, bsig, w1c, b1c, wv, bv) = params
    H2 = 2 * H

    w1 = jnp.zeros((F, LANES), jnp.float32)
    w1 = w1.at[:, 0:H].set(w1a).at[:, H:H2].set(w1c)

    wh = jnp.zeros((LANES, LANES), jnp.float32)
    wh = wh.at[0:H, 0].set(wmu[:, 0])
    wh = wh.at[0:H, 1].set(wsig[:, 0])
    wh = wh.at[H:H2, 2].set(wv[:, 0])

    b = jnp.zeros((2, LANES), jnp.float32)
    b = b.at[0, 0:H].set(b1a[0]).at[0, H:H2].set(b1c[0])
    b = b.at[1, 0].set(bmu[0, 0]).at[1, 1].set(bsig[0, 0]).at[1, 2].set(bv[0, 0])
    return w1, wh, b


# ------------------------- parser glue (plain JAX) ---------------------------
def parse_obs(x, edge_index, edge_attr):
    """Densify (edge_index, edge_attr) into an [N, N] weighted adjacency with
    self-loops and GCN-style row normalization. Setup glue, not the hot path."""
    adj = jnp.zeros((N, N), dtype=jnp.float32)
    adj = adj.at[edge_index[0], edge_index[1]].add(edge_attr)
    adj = adj + jnp.eye(N, dtype=jnp.float32)
    deg = jnp.sum(adj, axis=1, keepdims=True)
    adj = adj / jnp.maximum(deg, 1e-6)
    return adj, x


# ----------------------------- reference (jnp) -------------------------------
def a2c_reference(adj, x, params):
    (w1a, b1a, wmu, bmu, wsig, bsig, w1c, b1c, wv, bv) = params
    agg = adj @ x
    h_a = jnp.maximum(agg @ w1a + b1a, 0.0)
    mu = h_a @ wmu + bmu
    sigma = jnp.logaddexp(h_a @ wsig + bsig, 0.0)
    h_c = jnp.maximum(agg @ w1c + b1c, 0.0)
    value = jnp.sum(h_c @ wv + bv, axis=0, keepdims=True)
    return mu, sigma, value


# --------------------------------- main --------------------------------------
if __name__ == "__main__":
    key = jax.random.PRNGKey(0)
    keys = jax.random.split(key, 16)

    B = 16   # graphs per call; 8 graphs per grid step -> 2 grid steps

    def make_graph(k):
        ks = jax.random.split(k, 4)
        xg = jax.random.normal(ks[0], (N, F), dtype=jnp.float32)
        src = jax.random.randint(ks[1], (E,), 0, N)
        dst = jax.random.randint(ks[2], (E,), 0, N)
        attr = jax.random.uniform(ks[3], (E,), dtype=jnp.float32)
        return parse_obs(xg, jnp.stack([src, dst], axis=0), attr)

    graphs = [make_graph(k) for k in jax.random.split(keys[0], B)]
    adj = jnp.stack([g[0] for g in graphs])   # [B, N, N]
    x = jnp.stack([g[1] for g in graphs])     # [B, N, F]

    # deterministic parameter init (Glorot-ish scaling), small nonzero biases
    def init(k, shape, fan_in):
        return jax.random.normal(k, shape, dtype=jnp.float32) / jnp.sqrt(fan_in)

    w1a = init(keys[1], (F, H), F)
    wmu = init(keys[2], (H, 1), H)
    wsig = init(keys[3], (H, 1), H)
    w1c = init(keys[4], (F, H), F)
    wv = init(keys[5], (H, 1), H)
    b1a = 0.1 * jax.random.normal(keys[6], (1, H), dtype=jnp.float32)
    b1c = 0.1 * jax.random.normal(keys[7], (1, H), dtype=jnp.float32)
    bmu = 0.1 * jax.random.normal(keys[8], (1, 1), dtype=jnp.float32)
    bsig = 0.1 * jax.random.normal(keys[9], (1, 1), dtype=jnp.float32)
    bv = 0.1 * jax.random.normal(keys[10], (1, 1), dtype=jnp.float32)
    params = (w1a, b1a, wmu, bmu, wsig, bsig, w1c, b1c, wv, bv)

    packed = pack_params(params)

    slab, vals = a2c_forward(adj, x, packed)
    jax.block_until_ready((slab, vals))

    mu, sigma, value = unpack_outputs(slab, vals)

    # correctness check vs. a plain-JAX f32 reference (bf16 MXU operands with
    # f32 accumulation -> errors of a few 1e-3 at these magnitudes)
    ok = True
    for bi in range(B):
        mu_r, sigma_r, value_r = a2c_reference(adj[bi], x[bi], params)
        ok &= bool(jnp.allclose(mu[bi], mu_r, atol=2e-2, rtol=2e-2))
        ok &= bool(jnp.allclose(sigma[bi], sigma_r, atol=2e-2, rtol=2e-2))
        ok &= bool(jnp.allclose(value[bi], value_r, atol=5e-2, rtol=5e-2))
    assert ok, "mismatch vs. reference"

    # TODO(synk): select_action's Normal/Dirichlet sampling and training_step's
    # Adam updates / grad clipping are host-side control logic, not part of the
    # forward kernel.
    print("KERNEL_OK")
</pallas_src>

<mosaic_0001>
module attributes {stable_mosaic.version = 11 : i64} {
  func.func @a2c_kernel(%arg0: i32, %arg1: memref<1x128x128xbf16, #tpu.memory_space<vmem>>, %arg2: memref<1x128x128xbf16, #tpu.memory_space<vmem>>, %arg3: memref<128x128xbf16, #tpu.memory_space<vmem>>, %arg4: memref<2x128xf32, #tpu.memory_space<vmem>>, %arg5: memref<8x128xf32, #tpu.memory_space<vmem>>, %arg6: memref<1x128x128xf32, #tpu.memory_space<vmem>>, %arg7: memref<1x8x128xf32, #tpu.memory_space<vmem>>) attributes {dimension_semantics = [#tpu.dimension_semantics<arbitrary>], iteration_bounds = array<i64: 2>, scalar_prefetch = 0 : i64, scratch_operands = 0 : i64, tpu.core_type = #tpu.core_type<tc>, window_params = [{transform_indices = @transform_0, window_bounds = array<i64: 1, 128, 128>}, {transform_indices = @transform_1, window_bounds = array<i64: 1, 128, 128>}, {pipeline_mode = #tpu.pipeline_mode<synchronous>, transform_indices = @transform_2, window_bounds = array<i64: 128, 128>}, {pipeline_mode = #tpu.pipeline_mode<synchronous>, transform_indices = @transform_3, window_bounds = array<i64: 2, 128>}, {pipeline_mode = #tpu.pipeline_mode<synchronous>, transform_indices = @transform_4, window_bounds = array<i64: 8, 128>}, {transform_indices = @transform_5, window_bounds = array<i64: 1, 128, 128>}, {transform_indices = @transform_6, window_bounds = array<i64: 1, 8, 128>}]} {
    %c0 = arith.constant 0 : index
    %c0_0 = arith.constant 0 : index
    %0 = vector.load %arg4[%c0, %c0_0] : memref<2x128xf32, #tpu.memory_space<vmem>>, vector<1x128xf32>
    %c1 = arith.constant 1 : index
    %c0_1 = arith.constant 0 : index
    %1 = vector.load %arg4[%c1, %c0_1] : memref<2x128xf32, #tpu.memory_space<vmem>>, vector<1x128xf32>
    %c0_2 = arith.constant 0 : index
    %c0_3 = arith.constant 0 : index
    %c0_4 = arith.constant 0 : index
    %2 = vector.load %arg1[%c0_2, %c0_3, %c0_4] : memref<1x128x128xbf16, #tpu.memory_space<vmem>>, vector<1x128x128xbf16>
    %3 = vector.shape_cast %2 : vector<1x128x128xbf16> to vector<128x128xbf16>
    %c0_5 = arith.constant 0 : index
    %c0_6 = arith.constant 0 : index
    %c0_7 = arith.constant 0 : index
    %4 = vector.load %arg2[%c0_5, %c0_6, %c0_7] : memref<1x128x128xbf16, #tpu.memory_space<vmem>>, vector<1x128x128xbf16>
    %5 = vector.shape_cast %4 : vector<1x128x128xbf16> to vector<128x128xbf16>
    %cst = arith.constant dense<0.000000e+00> : vector<128x128xf32>
    %6 = tpu.matmul %3, %5, %cst {dimension_numbers = #tpu.dot_dimension_numbers<[1], [0], [0], [1], [0, 0, 1, 1], [], []>} : vector<128x128xbf16>, vector<128x128xbf16>, vector<128x128xf32> -> vector<128x128xf32>
    %7 = vector.broadcast %0 : vector<1x128xf32> to vector<128x128xf32>
    %8 = arith.addf %6, %7 : vector<128x128xf32>
    %cst_8 = arith.constant 0.000000e+00 : f32
    %9 = vector.broadcast %cst_8 : f32 to vector<128x128xf32>
    %10 = arith.maximumf %8, %9 : vector<128x128xf32>
    %11 = arith.truncf %10 : vector<128x128xf32> to vector<128x128xbf16>
    %c0_9 = arith.constant 0 : index
    %c0_10 = arith.constant 0 : index
    %12 = vector.load %arg3[%c0_9, %c0_10] : memref<128x128xbf16, #tpu.memory_space<vmem>>, vector<128x128xbf16>
    %cst_11 = arith.constant dense<0.000000e+00> : vector<128x128xf32>
    %13 = tpu.matmul %11, %12, %cst_11 {dimension_numbers = #tpu.dot_dimension_numbers<[1], [0], [0], [1], [0, 0, 1, 1], [], []>} : vector<128x128xbf16>, vector<128x128xbf16>, vector<128x128xf32> -> vector<128x128xf32>
    %14 = vector.broadcast %1 : vector<1x128xf32> to vector<128x128xf32>
    %15 = arith.addf %13, %14 : vector<128x128xf32>
    %16 = vector.extract_strided_slice %15 {offsets = [0, 1], sizes = [128, 1], strides = [1, 1]} : vector<128x128xf32> to vector<128x1xf32>
    %cst_12 = arith.constant 0.000000e+00 : f32
    %17 = vector.broadcast %cst_12 : f32 to vector<128x1xf32>
    %18 = arith.maximumf %16, %17 : vector<128x1xf32>
    %19 = vector.broadcast %cst_12 : f32 to vector<128x1xf32>
    %20 = arith.subf %16, %19 : vector<128x1xf32>
    %21 = arith.cmpf one, %20, %20 : vector<128x1xf32>
    %22 = vector.broadcast %cst_12 : f32 to vector<128x1xf32>
    %23 = arith.addf %16, %22 : vector<128x1xf32>
    %24 = math.absf %20 : vector<128x1xf32>
    %cst_13 = arith.constant 0.000000e+00 : f32
    %25 = vector.broadcast %cst_13 : f32 to vector<128x1xf32>
    %26 = arith.subf %25, %24 : vector<128x1xf32>
    %27 = math.exp %26 : vector<128x1xf32>
    %28 = math.log1p %27 : vector<128x1xf32>
    %29 = arith.addf %18, %28 : vector<128x1xf32>
    %30 = arith.select %21, %23, %29 : vector<128x1xi1>, vector<128x1xf32>
    %31 = tpu.iota {dimensions = array<i32: 1>} : vector<128x128xi32>
    %c1_i32 = arith.constant 1 : i32
    %32 = vector.broadcast %c1_i32 : i32 to vector<128x128xi32>
    %33 = arith.cmpi eq, %31, %32 : vector<128x128xi32>
    %34 = vector.shape_cast %30 : vector<128x1xf32> to vector<128x1xf32>
    %35 = vector.broadcast %34 : vector<128x1xf32> to vector<128x128xf32>
    %36 = arith.select %33, %35, %15 : vector<128x128xi1>, vector<128x128xf32>
    %c0_14 = arith.constant 0 : index
    %c0_15 = arith.constant 0 : index
    %c0_16 = arith.constant 0 : index
    %37 = vector.load %arg6[%c0_14, %c0_15, %c0_16] : memref<1x128x128xf32, #tpu.memory_space<vmem>>, vector<1x128x128xf32>
    %38 = vector.shape_cast %37 : vector<1x128x128xf32> to vector<128x128xf32>
    %39 = vector.shape_cast %36 : vector<128x128xf32> to vector<1x128x128xf32>
    tpu.vector_store %arg6[%c0_14, %c0_15, %c0_16], %39 {strides = array<i32>} : memref<1x128x128xf32, #tpu.memory_space<vmem>>, vector<1x128x128xf32>,
    %c0_17 = arith.constant 0 : index
    %c0_18 = arith.constant 0 : index
    %40 = vector.load %arg5[%c0_17, %c0_18] : memref<8x128xf32, #tpu.memory_space<vmem>>, vector<8x128xf32>
    %cst_19 = arith.constant dense<0.000000e+00> : vector<8x128xf32>
    %41 = tpu.matmul %40, %15, %cst_19 {dimension_numbers = #tpu.dot_dimension_numbers<[1], [0], [0], [1], [0, 0, 1, 1], [], []>} : vector<8x128xf32>, vector<128x128xf32>, vector<8x128xf32> -> vector<8x128xf32>
    %c0_20 = arith.constant 0 : index
    %c0_21 = arith.constant 0 : index
    %c0_22 = arith.constant 0 : index
    %42 = vector.load %arg7[%c0_20, %c0_21, %c0_22] : memref<1x8x128xf32, #tpu.memory_space<vmem>>, vector<1x8x128xf32>
    %43 = vector.shape_cast %42 : vector<1x8x128xf32> to vector<8x128xf32>
    %44 = vector.shape_cast %41 : vector<8x128xf32> to vector<1x8x128xf32>
    tpu.vector_store %arg7[%c0_20, %c0_21, %c0_22], %44 {strides = array<i32>} : memref<1x8x128xf32, #tpu.memory_space<vmem>>, vector<1x8x128xf32>,
    return
  }
  func.func @transform_0(%arg0: i32) -> (i32, i32, i32) {
    %c0_i32 = arith.constant 0 : i32
    %c0_i32_0 = arith.constant 0 : i32
    %c0_i32_1 = arith.constant 0 : i32
    return %arg0, %c0_i32, %c0_i32_0 : i32, i32, i32
  }
  func.func @transform_1(%arg0: i32) -> (i32, i32, i32) {
    %c0_i32 = arith.constant 0 : i32
    %c0_i32_0 = arith.constant 0 : i32
    %c0_i32_1 = arith.constant 0 : i32
    return %arg0, %c0_i32, %c0_i32_0 : i32, i32, i32
  }
  func.func @transform_2(%arg0: i32) -> (i32, i32) {
    %c0_i32 = arith.constant 0 : i32
    %c0_i32_0 = arith.constant 0 : i32
    %c0_i32_1 = arith.constant 0 : i32
    return %c0_i32, %c0_i32_0 : i32, i32
  }
  func.func @transform_3(%arg0: i32) -> (i32, i32) {
    %c0_i32 = arith.constant 0 : i32
    %c0_i32_0 = arith.constant 0 : i32
    %c0_i32_1 = arith.constant 0 : i32
    return %c0_i32, %c0_i32_0 : i32, i32
  }
  func.func @transform_4(%arg0: i32) -> (i32, i32) {
    %c0_i32 = arith.constant 0 : i32
    %c0_i32_0 = arith.constant 0 : i32
    %c0_i32_1 = arith.constant 0 : i32
    return %c0_i32, %c0_i32_0 : i32, i32
  }
  func.func @transform_5(%arg0: i32) -> (i32, i32, i32) {
    %c0_i32 = arith.constant 0 : i32
    %c0_i32_0 = arith.constant 0 : i32
    %c0_i32_1 = arith.constant 0 : i32
    return %arg0, %c0_i32, %c0_i32_0 : i32, i32, i32
  }
  func.func @transform_6(%arg0: i32) -> (i32, i32, i32) {
    %c0_i32 = arith.constant 0 : i32
    %c0_i32_0 = arith.constant 0 : i32
    %c0_i32_1 = arith.constant 0 : i32
    return %arg0, %c0_i32, %c0_i32_0 : i32, i32, i32
  }
}

</mosaic_0001>

<bundles_post_ra>
// kernel: tpu_custom_call.1
= control target key start
LH: loop header
LB: loop body
LE: loop exit
PB: predicated region body
PF: predicated region fallthrough
CT: control target
= control target key end

     0   :  { %s2727_s0 = inlined_call_operand.hbm [shape: bf16[2,128,128], index: 0, kind: input, shape index: {}]   ;;  %s2728_s1 = inlined_call_operand.hbm [shape: bf16[2,128,128], index: 1, kind: input, shape index: {}]   ;;  %s2729_s2 = inlined_call_operand.hbm [shape: bf16[128,128], index: 2, kind: input, shape index: {}]   ;;  %s2730_s3 = inlined_call_operand.vmem [shape: f32[2,128], index: 3, kind: input, shape index: {}]   ;;  %s2731_s4 = inlined_call_operand.vmem [shape: f32[8,128], index: 4, kind: input, shape index: {}]   ;;  %s2732_s5 = inlined_call_operand.hbm [shape: f32[2,128,128], index: 5, kind: output, shape index: {0}]   ;;  %s2733_s6 = inlined_call_operand.hbm [shape: f32[2,8,128], index: 6, kind: output, shape index: {1}]  }
   0x1   :  { %2744 = sst [smem:[#allocation19_spill]] %s2727_s0 }
   0x2   :  { %2745 = sst [smem:[#allocation20_spill]] %s2729_s2 }
   0x3   :  { %12 = vsyncpa [#allocation3], 0 }
   0x4   :  { %14 = vsyncpa [#allocation3 + $0x1], 0 }
   0x5   :  { %15 = vsyncpa [#allocation6], 0 }
   0x6   :  { %17 = vsyncpa [#allocation6 + $0x1], 0 }
   0x7   :  { %18 = vsyncpa [#allocation4], 0 }
   0x8   :  { %20 = vsyncpa [#allocation4 + $0x1], 0 }
   0x9   :  { %21 = vsyncpa [#allocation10], 0 }
   0xa   :  { %23 = vsyncpa [#allocation10 + $0x1], 0  ;;  %s2033_s21 = smov 0   ;;  %s2035_s22 = smov 0  }
   0xb   :  { %s2037_s23 = smov 0   ;;  %s2039_s24 = smov 0  }
   0xc LB: > { %2746 = sst [smem:[#allocation16_spill]] %s1979_s23  ;;  %s2054_s25 = sadd.s32 4294967295, %s1983_s24   ;;  %s1983_s24 = sphi %s2039_s24, %s2780_s24   ;;  %s1979_s23 = sphi %s2037_s23, %s2782_s23   ;;  %s1975_s22 = sphi %s2035_s22, %s2784_s22   ;;  %s1971_s21 = sphi %s2033_s21, %s2783_s21  }
   0xd   : > { %s1400_s26 = sadd.s32 4294967294, %s1983_s24   ;;  %p49_p0 = scmp.ne.s32.totalorder %s1975_s22, %s1971_s21 }
   0xe   : > { %p2734_p1 = scmp.eq.s32.totalorder %s2054_s25, 0  ;;  %p168_p3 = scmp.eq.s32.totalorder %s1400_s26, 1 }
   0xf   : > { %p1401_p5 = scmp.ge.s32.totalorder %s1983_s24, 1  ;;  %p201_p7 = scmp.lt.s32.totalorder %s1983_s24, 3 }
  0x10   : > { %p2063_p4 = por %p2734_p1, %p49_p0  ;;  %p2068_p6 = por %p168_p3, %p49_p0 }
  0x11   : > { %p2073_p8 = pnand %p1401_p5, %p201_p7  ;;  %s1985_s30 = smov [#allocation7]  }
  0x12   : > { %s2747_s27 = scalar_select %p2063_p4, 1, 0 }
  0x13   : > { %s2748_s28 = scalar_select %p2068_p6, 1, 0 }
  0x14   : > { %s2749_s29 = scalar_select %p2073_p8, 1, 0 }
  0x15   : > { %s213_s7 = sshll.u32 %s1985_s30, 4  ;;  %p1636_p9 = pneg %p2073_p8  ;;  %s2077_s7 = int_to_ptr.vmem [resolvable:$true] %s213_s7 }
  0x16   : > { %s2089_s9 = sadd.s32 1, %s1983_s24   ;;  %s36_s10 = sadd.s32 1, %s1979_s23 }
  0x17   : > { %p2084_p11 = pnand %p1636_p9, %p2734_p1  ;;  %2751 = sst [smem:[#allocation17_spill]] %s2089_s9 }
  0x18   : > { %s33_s11 = ssub.s32 %s1983_s24, %s2089_s9  ;;  %s2752_s2 = sld [smem:[#allocation20_spill]] }
  0x19   : > { %p1791_p13 = pneg %p2084_p11 }
  0x1e   : > { %s1789_s14 = scalar_lea.hbm %s2752_s2, 1024 }
  0x1f   : > { %p1790_p12 = scmp.ne.s32.totalorder %s2752_s2, %s1789_s14  ;;  %p1796_p5 = scmp.lt.u32.totalorder %s1789_s14, %s2752_s2 }
  0x21   : > { %p1792_p0 = pnand %p1791_p13, %p1790_p12 }
  0x23   : > { %p1793_p3 = pneg %p1792_p0 }
  0x25   : > { %p1798_p7 = pnand %p1796_p5, %p1793_p3 }
  0x27   : > { %1801 = shalt.err (!%p1798_p7)
}
  0x28   : > { %s1802_s19 = scalar_lea.vmem %s2077_s7, 1024  ;;  %p1810_p2 = scmp.lt.s32.totalorder %s2077_s7, %s2077_s7 }
  0x29   : > { %p1803_p9 = scmp.ne.s32.totalorder %s2077_s7, %s1802_s19  ;;  %p1811_p6 = scmp.lt.s32.totalorder %s1802_s19, %s1802_s19 }
  0x2b   : > { %p1805_p10 = pnand %p1803_p9, %p1791_p13  ;;  %p1812_p4 = por %p1811_p6, %p1810_p2 }
  0x2d   : > { %p1806_p1 = pneg %p1805_p10 }
  0x2f   : > { %p1813_p8 = pnand %p1812_p4, %p1806_p1 }
  0x31   : > { %1816 = shalt.err (!%p1813_p8)
}
  0x32   : > { %s2737_s20 = smov 64   ;;  %s2739_s26 = smov 4  }
  0x33   : > { %1639 = dma.hbm_to_vmem [thread:$0]  (!%p2084_p11), %s2752_s2, 1024, %s2077_s7, [#allocation6], %s2737_s20, %s2737_s20, %s2739_s26  }
  0x34   : > { %p34_p1 = scmp.eq.s32.totalorder %s33_s11, 0  ;;  %p43_p2 = scmp.ne.s32.totalorder %s1979_s23, %s1975_s22 }
  0x35   : > { %p44_p4 = scmp.eq.s32.totalorder %s1983_s24, 0  ;;  %p1655_p6 = scmp.lt.s32.totalorder %s1983_s24, 2 }
  0x36   : > { %s2123_s13 = scalar_select %p34_p1, %s1979_s23, %s36_s10  }
  0x37   : > { %p45_p8 = por %p44_p4, %p43_p2  ;;  %p2754_p10 = scmp.eq.s32.totalorder %s2054_s25, 1 }
  0x38   : > { %2753 = sst [smem:[#allocation18_spill]] %s2123_s13  ;;  %s233_s8 = sand.u32 1, %s1979_s23  }
  0x39   : > { %p2127_p12 = por %p2754_p10, %p43_p2  ;;  %s1449_s15 = sshll.u32 %s1983_s24, 10 }
  0x3a   : > { %s2133_s16 = sshll.u32 %s233_s8, 6  ;;  %s2756_s0 = sld [smem:[#allocation19_spill]] }
  0x3b   : > { %s237_s10 = scalar_lea.vmem [#allocation2], %s2133_s16  ;;  %p2141_p11 = pnand %p1655_p6, %p45_p8 }
  0x3c   : > { %s244_s11 = sshll.u32 %s237_s10, 4  ;;  %s2150_s17 = scalar_lea.hbm %s2728_s1, %s1449_s15  ;;  %s2145_s11 = int_to_ptr.vmem [resolvable:$true] %s244_s11 }
  0x3d   : > { %s2152_s18 = scalar_lea.sflag [#allocation3], %s233_s8  ;;  %p1819_p0 = pneg %p2141_p11 }
  0x40   : > { %s2138_s7 = scalar_lea.hbm %s2756_s0, %s1449_s15  ;;  %s1822_s2 = scalar_lea.hbm %s2756_s0, 2048 }
  0x41   : > { %s1817_s20 = scalar_lea.hbm %s2138_s7, 1024  ;;  %p1823_p7 = scmp.lt.u32.totalorder %s2138_s7, %s2756_s0 }
  0x42   : > { %p1818_p13 = scmp.ne.s32.totalorder %s2138_s7, %s1817_s20  ;;  %p1824_p9 = scmp.lt.u32.totalorder %s1822_s2, %s1817_s20 }
  0x43   : > { %p1826_p2 = scmp.lt.u32.totalorder %s1817_s20, %s2138_s7 }
  0x44   : > { %p1820_p3 = pnand %p1819_p0, %p1818_p13  ;;  %p1825_p1 = por %p1824_p9, %p1823_p7 }
  0x46   : > { %p1821_p5 = pneg %p1820_p3  ;;  %p1827_p4 = por %p1826_p2, %p1825_p1 }
  0x48   : > { %p1828_p6 = pnand %p1827_p4, %p1821_p5 }
  0x4a   : > { %1831 = shalt.err (!%p1828_p6)
}
  0x4b   : > { %s1832_s8 = scalar_lea.vmem %s2145_s11, 1024  ;;  %s1988_s26 = smov [#allocation2]  }
  0x4c   : > { %p1833_p8 = scmp.ne.s32.totalorder %s2145_s11, %s1832_s8  ;;  %s1837_s15 = sshll.u32 %s1988_s26, 4  ;;  %s1838_s15 = int_to_ptr.vmem [resolvable:$false] %s1837_s15 }
  0x4d   : > { %s1839_s23 = scalar_lea.vmem %s1838_s15, 2048  ;;  %p1840_p3 = scmp.lt.s32.totalorder %s2145_s11, %s1838_s15 }
  0x4e   : > { %p1835_p10 = pnand %p1833_p8, %p1819_p0  ;;  %p1841_p7 = scmp.lt.s32.totalorder %s1839_s23, %s1832_s8 }
  0x50   : > { %p1836_p13 = pneg %p1835_p10  ;;  %p1842_p9 = por %p1841_p7, %p1840_p3 }
  0x52   : > { %p1843_p1 = pnand %p1842_p9, %p1836_p13 }
  0x54   : > { %1846 = shalt.err (!%p1843_p1)
}
  0x55   : > { %s2758_s2 = smov 4   ;;  %s2759_s20 = smov 64  }
  0x56   : > { %1643 = dma.hbm_to_vmem [thread:$0]  (!%p2141_p11), %s2138_s7, 1024, %s2145_s11, %s2152_s18, %s2759_s20, %s2759_s20, %s2758_s2  }
  0x57   : > { %s258_s13 = scalar_lea.vmem [#allocation5], %s2133_s16  ;;  %s254_s12 = sand.u32 1, %s1983_s24  }
  0x58   : > { %s265_s30 = sshll.u32 %s258_s13, 4  ;;  %s2187_s10 = scalar_lea.sflag [#allocation6], %s254_s12  ;;  %s2185_s30 = int_to_ptr.vmem [resolvable:$true] %s265_s30 }
  0x59   : > { %s1847_s8 = scalar_lea.hbm %s2150_s17, 1024  ;;  %s1852_s23 = scalar_lea.hbm %s2728_s1, 2048 }
  0x5a   : > { %p1848_p5 = scmp.ne.s32.totalorder %s2150_s17, %s1847_s8  ;;  %p1853_p6 = scmp.lt.u32.totalorder %s2150_s17, %s2728_s1 }
  0x5b   : > { %p1854_p8 = scmp.lt.u32.totalorder %s1852_s23, %s1847_s8  ;;  %p1856_p13 = scmp.lt.u32.totalorder %s1847_s8, %s2150_s17 }
  0x5c   : > { %p1850_p2 = pnand %p1848_p5, %p1819_p0 }
  0x5d   : > { %p1855_p10 = por %p1854_p8, %p1853_p6 }
  0x5e   : > { %p1851_p4 = pneg %p1850_p2 }
  0x5f   : > { %p1857_p3 = por %p1856_p13, %p1855_p10 }
  0x61   : > { %p1858_p7 = pnand %p1857_p3, %p1851_p4 }
  0x63   : > { %1861 = shalt.err (!%p1858_p7)
}
  0x64   : > { %s1862_s16 = scalar_lea.vmem %s2185_s30, 1024  ;;  %s1989_s7 = smov [#allocation5]  }
  0x65   : > { %p1863_p9 = scmp.ne.s32.totalorder %s2185_s30, %s1862_s16  ;;  %s1867_s11 = sshll.u32 %s1989_s7, 4  ;;  %s1868_s11 = int_to_ptr.vmem [resolvable:$false] %s1867_s11 }
  0x66   : > { %s1869_s0 = scalar_lea.vmem %s1868_s11, 2048  ;;  %p1870_p2 = scmp.lt.s32.totalorder %s2185_s30, %s1868_s11 }
  0x67   : > { %p1865_p1 = pnand %p1863_p9, %p1819_p0  ;;  %p1871_p6 = scmp.lt.s32.totalorder %s1869_s0, %s1862_s16 }
  0x69   : > { %p1866_p5 = pneg %p1865_p1  ;;  %p1872_p8 = por %p1871_p6, %p1870_p2 }
  0x6b   : > { %p1873_p10 = pnand %p1872_p8, %p1866_p5 }
  0x6d   : > { %1876 = shalt.err (!%p1873_p10)
}
  0x6e   : > { %1646 = dma.hbm_to_vmem [thread:$0]  (!%p2141_p11), %s2150_s17, 1024, %s2185_s30, %s2187_s10, %s2759_s20, %s2759_s20, %s2758_s2  }
  0x6f   : > { %p2760_p0 = scmp.ne.s32.totalorder %s2749_s29, 0 }
  0x70   : > { %s2219_s9 = sand.u32 (!%p2760_p0), 1, %s1975_s22   ;;  %p2761_p4 = scmp.ne.s32.totalorder (!%p2760_p0), %s2747_s27, 0 }
  0x71   : > { %277 = sbr.rel (%p2760_p0) target bundleno = 858 (0x35a), region = 40  ;;  %s1411_s18 = sshll.u32 (!%p2760_p0), %s2219_s9, 6 }
  0x72   : > { %s280_s13 = scalar_lea.sflag (!%p2760_p0), [#allocation3], %s2219_s9  ;;  %s2223_s12 = scalar_lea.vmem (!%p2760_p0), [#allocation2], %s1411_s18 }
  0x78   : > { %1950 = dma.done.wait (%p2761_p4), %s280_s13, 1024  }
  0x79   : > { %1952 = vsyncadd (%p2761_p4), %s280_s13, 4294966272  ;;  %s288_s19 = sand.u32 1, %s2054_s25   ;;  %s2230_s17 = scalar_lea.vmem [#allocation5], %s1411_s18 }
  0x7a   : > { %s289_s29 = scalar_lea.sflag [#allocation6], %s288_s19 }
  0x7b   : > { %1954 = dma.done.wait (%p2761_p4), %s289_s29, 1024  }
  0x7c   : > { %1956 = vsyncadd (%p2761_p4), %s289_s29, 4294966272  ;;  %p2762_p11 = scmp.eq.s32.totalorder %s2054_s25, 0 }
  0x7e   : > { %1958 = dma.done.wait (%p2762_p11), [#allocation6], 1024   ;;  %p2763_p13 = pmov %p2762_p11 }
  0x7f   : > { %v1701_v0 = vld [vmem:[%s2230_s17] sm:$0xff]   ;;  %v1702_v1 = vld [vmem:[%s2230_s17 + $0x8] sm:$0xff]   ;;  %v1703_v2 = vld [vmem:[%s2230_s17 + $0x10] sm:$0xff]   ;;  %vm1992_vm0 = vmmov 0   ;;  %s1414_s26 = sshll.u32 %s2219_s9, 7  ;;  %s1451_s23 = sshll.u32 %s2054_s25, 11 }
  0x80   : > { %1960 = vsyncadd (%p2763_p13), [#allocation6], 4294966272  ;;  %1501 = vmatprep.subr.bf16.mxu0 %v1701_v0  ;;  %v1704_v3 = vld [vmem:[%s2230_s17 + $0x18] sm:$0xff]   ;;  %v1709_v4 = vld [vmem:[%s2223_s12] sm:$0xff]   ;;  %s2597_s15 = scalar_lea.vmem [#allocation8], %s1414_s26  ;;  %s2647_s0 = scalar_lea.hbm %s2732_s5, %s1451_s23 }
  0x81   : > { %1502 = vmatpush3.bf16.msra.mxu0 %v1701_v0  ;;  %1517 = vmatprep.mubr.bf16.mxu0 %v1709_v4  ;;  %v1705_v5 = vld [vmem:[%s2230_s17 + $0x20] sm:$0xff]   ;;  %v1706_v6 = vld [vmem:[%s2230_s17 + $0x28] sm:$0xff]   ;;  %v1707_v9 = vld [vmem:[%s2230_s17 + $0x30] sm:$0xff]   ;;  %s1250_s16 = sshll.u32 %s2597_s15, 4  ;;  %s1232_s18 = scalar_lea.sflag [#allocation4], %s2219_s9  ;;  %s2649_s16 = int_to_ptr.vmem [resolvable:$true] %s1250_s16 }
  0x82   : > { %1503 = vmatprep.subr.bf16.mxu0 %v1702_v1  ;;  %v1717_v7 = vld [vmem:[#allocation7] sm:$0xff]   ;;  %v1718_v8 = vld [vmem:[#allocation7 + $0x8] sm:$0xff]   ;;  %v1719_v10 = vld [vmem:[#allocation7 + $0x10] sm:$0xff]   ;;  %s1877_s13 = scalar_lea.vmem %s2649_s16, 2048 }
  0x83   : > { %1533 = vmatprep.subr.bf16.mxu1 %v1717_v7  ;;  %v1708_v11 = vld [vmem:[%s2230_s17 + $0x38] sm:$0xff]   ;;  %v1721_v13 = vld [vmem:[#allocation7 + $0x20] sm:$0xff]   ;;  %v1710_v14 = vld [vmem:[%s2223_s12 + $0x8] sm:$0xff]   ;;  %p1878_p3 = scmp.ne.s32.totalorder %s2649_s16, %s1877_s13 }
  0x84   : > { %1534 = vmatpush3.bf16.msra.mxu1 %v1717_v7  ;;  %v1720_v12 = vld [vmem:[#allocation7 + $0x18] sm:$0xff]   ;;  %v1711_v15 = vld [vmem:[%s2223_s12 + $0x10] sm:$0xff]   ;;  %v1722_v16 = vld [vmem:[#allocation7 + $0x28] sm:$0xff]  }
  0x85   : > { %1504 = vmatpush3.bf16.msra.mxu0 %v1702_v1  ;;  %1535 = vmatprep.subr.bf16.mxu1 %v1718_v8  ;;  %v1712_v17 = vld [vmem:[%s2223_s12 + $0x18] sm:$0xff]   ;;  %v1713_v18 = vld [vmem:[%s2223_s12 + $0x20] sm:$0xff]   ;;  %v1714_v19 = vld [vmem:[%s2223_s12 + $0x28] sm:$0xff]   ;;  %p1879_p7 = pnand %p1878_p3, %p2127_p12 }
  0x86   : > { %1505 = vmatprep.subr.bf16.mxu0 %v1703_v2  ;;  %v1715_v20 = vld [vmem:[%s2223_s12 + $0x30] sm:$0xff]   ;;  %v1716_v21 = vld [vmem:[%s2223_s12 + $0x38] sm:$0xff]   ;;  %v1416_v24 = vld [vmem:[%s2730_s3] ss:$0 sm:$0xff]  ;;  %s1994_s12 = smov [#allocation8]  }
  0x87   : > { %v1723_v22 = vld [vmem:[#allocation7 + $0x30] sm:$0xff]   ;;  %v1724_v23 = vld [vmem:[#allocation7 + $0x38] sm:$0xff]   ;;  %p1880_p9 = pneg %p1879_p7  ;;  %s1881_s19 = sshll.u32 %s1994_s12, 4  ;;  %s1882_s19 = int_to_ptr.vmem [resolvable:$false] %s1881_s19 }
  0x88   : > { %1536 = vmatpush3.bf16.msra.mxu1 %v1718_v8  ;;  %s1883_s29 = scalar_lea.vmem %s1882_s19, 4096  ;;  %p1884_p1 = scmp.lt.s32.totalorder %s2649_s16, %s1882_s19 }
  0x89   : > { %1506 = vmatpush3.bf16.msra.mxu0 %v1703_v2  ;;  %1537 = vmatprep.subr.bf16.mxu1 %v1719_v10  ;;  %p1885_p5 = scmp.lt.s32.totalorder %s1883_s29, %s1877_s13 }
  0x8a   : > { %1507 = vmatprep.subr.bf16.mxu0 %v1704_v3 }
  0x8b   : > { %p1886_p2 = por %p1885_p5, %p1884_p1 }
  0x8c   : > { %1538 = vmatpush3.bf16.msra.mxu1 %v1719_v10 }
  0x8d   : > { %1508 = vmatpush3.bf16.msra.mxu0 %v1704_v3  ;;  %1539 = vmatprep.subr.bf16.mxu1 %v1720_v12  ;;  %p1887_p6 = pnand %p1886_p2, %p1880_p9 }
  0x8e   : > { %1509 = vmatprep.subr.bf16.mxu0 %v1705_v5 }
  0x90   : > { %1540 = vmatpush3.bf16.msra.mxu1 %v1720_v12 }
  0x91   : > { %1510 = vmatpush3.bf16.msra.mxu0 %v1705_v5  ;;  %1541 = vmatprep.subr.bf16.mxu1 %v1721_v13 }
  0x92   : > { %1511 = vmatprep.subr.bf16.mxu0 %v1706_v6 }
  0x94   : > { %1542 = vmatpush3.bf16.msra.mxu1 %v1721_v13 }
  0x95   : > { %1512 = vmatpush3.bf16.msra.mxu0 %v1706_v6  ;;  %1543 = vmatprep.subr.bf16.mxu1 %v1722_v16 }
  0x96   : > { %1513 = vmatprep.subr.bf16.mxu0 %v1707_v9 }
  0x98   : > { %1544 = vmatpush3.bf16.msra.mxu1 %v1722_v16 }
  0x99   : > { %1514 = vmatpush3.bf16.msra.mxu0 %v1707_v9  ;;  %1545 = vmatprep.subr.bf16.mxu1 %v1723_v22 }
  0x9a   : > { %1515 = vmatprep.subr.bf16.mxu0 %v1708_v11 }
  0x9c   : > { %1546 = vmatpush3.bf16.msra.mxu1 %v1723_v22 }
  0x9d   : > { %1516 = vmatpush3.bf16.msra.mxu0 %v1708_v11  ;;  %1547 = vmatprep.subr.bf16.mxu1 %v1724_v23 }
  0xa0   : > { %1518 = vmatmul.mubr.bf16.vlgmr.msra.gmra.mrb[0].mxu0 %v1710_v14  ;;  %1548 = vmatpush3.bf16.msra.mxu1 %v1724_v23 }
  0xa1   : > { %1521 = vmatprep.mubr.bf16.mxu0 %v1711_v15 }
  0xa8   : > { %1522 = vmatmul.mubr.bf16.gmra.mrb[4].mxu0 %v1712_v17  ;;  %v1990_v17 = vmov 0.0|0.0  }
  0xa9   : > { %1525 = vmatprep.mubr.bf16.mxu0 %v1713_v18  ;;  %1600 = vmatprep.subr.bf16.mxu0 %v1990_v17  ;;  %v1991_v18 = vmov 1  }
  0xaa   : > { %1699 = vset.pattern.permute.xlu1 %v1991_v18  ;;  %1700 = vset.pattern.permute.xlu0 %v1991_v18 }
  0xb0   : > { %1526 = vmatmul.mubr.bf16.gmra.mrb[8].mxu0 %v1714_v19  ;;  %v1993_v19 = vmov 0.0  }
  0xb1   : > { %1529 = vmatprep.mubr.bf16.mxu0 %v1715_v20  ;;  %v2263_v20 = vld [vmem:[%s2730_s3 + $0x1] ss:$0 sm:$0xff] }
  0xb8   : > { %1530 = vmatmul.mubr.bf16.gmra.mrb[12].mxu0 %v1716_v21 }
  0xb9   : > { %1597 = vmatprep.mubr.msk.f32.mxu0 %vm1992_vm0, %v1993_v19 }
 0x173   : > { %v1519_v25 = vpop.f32.mrb[0].mxu0 }
 0x174   : > { %v513_v26 = vadd.f32 %v1519_v25, %v1416_v24  ;;  %v504_v27 = vpop.f32.mrb[1].mxu0 }
 0x175   : > { %v505_v28 = vadd.f32 %v1416_v24, %v504_v27  ;;  %v1520_v29 = vpop.f32.mrb[2].mxu0 }
 0x176   : > { %v516_v30 = vadd.f32 %v1520_v29, %v1416_v24  ;;  %v507_v31 = vpop.f32.mrb[3].mxu0  ;;  %v569_v33 = vmax.f32 %v513_v26, 0.0 }
 0x177   : > { %v508_v32 = vadd.f32 %v1416_v24, %v507_v31  ;;  %v567_v35 = vmax.f32 %v505_v28, 0.0 }
 0x178   : > { %v570_v34 = vmax.f32 %v516_v30, 0.0 }
 0x179   : > { %v568_v36 = vmax.f32 %v508_v32, 0.0 }
 0x17a   : > { %v584_v37 = vpack.c.bf16 %v570_v34, %v569_v33 }
 0x17b   : > { %v1523_v38 = vpop.f32.mrb[4].mxu0  ;;  %v583_v39 = vpack.c.bf16 %v568_v36, %v567_v35 }
 0x17c   : > { %v529_v40 = vadd.f32 %v1523_v38, %v1416_v24  ;;  %v520_v41 = vpop.f32.mrb[5].mxu0 }
 0x17d   : > { %v521_v42 = vadd.f32 %v1416_v24, %v520_v41  ;;  %v1524_v43 = vpop.f32.mrb[6].mxu0  ;;  %1549 = vmatprep.mubr.bf16.mxu1 %v583_v39 }
 0x17e   : > { %v532_v44 = vadd.f32 %v1524_v43, %v1416_v24  ;;  %v523_v45 = vpop.f32.mrb[7].mxu0  ;;  %1550 = vmatmul.mubr.bf16.vlgmr.msra.gmra.mrb[0].mxu1 %v584_v37  ;;  %v573_v47 = vmax.f32 %v529_v40, 0.0 }
 0x17f   : > { %v524_v46 = vadd.f32 %v1416_v24, %v523_v45  ;;  %v571_v49 = vmax.f32 %v521_v42, 0.0 }
 0x180   : > { %v574_v48 = vmax.f32 %v532_v44, 0.0 }
 0x181   : > { %v572_v50 = vmax.f32 %v524_v46, 0.0 }
 0x182   : > { %v586_v51 = vpack.c.bf16 %v574_v48, %v573_v47 }
 0x183   : > { %v585_v52 = vpack.c.bf16 %v572_v50, %v571_v49  ;;  %v1527_v53 = vpop.f32.mrb[8].mxu0 }
 0x184   : > { %v545_v54 = vadd.f32 %v1527_v53, %v1416_v24  ;;  %v536_v55 = vpop.f32.mrb[9].mxu0 }
 0x185   : > { %v537_v56 = vadd.f32 %v1416_v24, %v536_v55  ;;  %v1528_v57 = vpop.f32.mrb[10].mxu0  ;;  %1553 = vmatprep.mubr.bf16.mxu1 %v585_v52 }
 0x186   : > { %v548_v58 = vadd.f32 %v1528_v57, %v1416_v24  ;;  %v539_v59 = vpop.f32.mrb[11].mxu0  ;;  %1554 = vmatmul.mubr.bf16.gmra.mrb[4].mxu1 %v586_v51  ;;  %v577_v61 = vmax.f32 %v545_v54, 0.0 }
 0x187   : > { %v540_v60 = vadd.f32 %v1416_v24, %v539_v59  ;;  %v575_v63 = vmax.f32 %v537_v56, 0.0 }
 0x188   : > { %v578_v62 = vmax.f32 %v548_v58, 0.0 }
 0x189   : > { %v576_v0 = vmax.f32 %v540_v60, 0.0 }
 0x18a   : > { %v588_v1 = vpack.c.bf16 %v578_v62, %v577_v61 }
 0x18b   : > { %v587_v2 = vpack.c.bf16 %v576_v0, %v575_v63  ;;  %v1531_v3 = vpop.f32.mrb[12].mxu0 }
 0x18c   : > { %v561_v4 = vadd.f32 %v1531_v3, %v1416_v24  ;;  %v552_v5 = vpop.f32.mrb[13].mxu0 }
 0x18d   : > { %v553_v6 = vadd.f32 %v1416_v24, %v552_v5  ;;  %v1532_v7 = vpop.f32.mrb[14].mxu0  ;;  %1557 = vmatprep.mubr.bf16.mxu1 %v587_v2 }
 0x18e   : > { %v564_v8 = vadd.f32 %v1532_v7, %v1416_v24  ;;  %v555_v9 = vpop.f32.mrb[15].mxu0  ;;  %1558 = vmatmul.mubr.bf16.gmra.mrb[8].mxu1 %v588_v1  ;;  %v581_v11 = vmax.f32 %v561_v4, 0.0 }
 0x18f   : > { %v556_v10 = vadd.f32 %v1416_v24, %v555_v9  ;;  %v579_v13 = vmax.f32 %v553_v6, 0.0 }
 0x190   : > { %v582_v12 = vmax.f32 %v564_v8, 0.0 }
 0x191   : > { %v580_v14 = vmax.f32 %v556_v10, 0.0 }
 0x192   : > { %v590_v15 = vpack.c.bf16 %v582_v12, %v581_v11 }
 0x193   : > { %v589_v16 = vpack.c.bf16 %v580_v14, %v579_v13 }
 0x195   : > { %1561 = vmatprep.mubr.bf16.mxu1 %v589_v16 }
 0x196   : > { %1562 = vmatmul.mubr.bf16.gmra.mrb[12].mxu1 %v590_v15 }
 0x251   : > { %v1551_v21 = vpop.f32.mrb[0].mxu1 }
 0x252   : > { %v2266_v22 = vadd.f32 %v1551_v21, %v2263_v20  ;;  %v693_v23 = vpop.f32.mrb[1].mxu1 }
 0x253   : > { %v2269_v24 = vadd.f32 %v2263_v20, %v693_v23  ;;  %v1552_v25 = vpop.f32.mrb[2].mxu1 }
 0x254   : > { %v806_v26 = vand.u32 2147483647, %v2266_v22  ;;  %v2273_v27 = vadd.f32 %v1552_v25, %v2263_v20  ;;  %v696_v28 = vpop.f32.mrb[3].mxu1  ;;  %v758_v62 = vmax.f32 %v2266_v22, 0.0  ;;  %vm774_vm1 = vcmp.ne.f32.partialorder %v2266_v22, %v2266_v22 }
 0x255   : > { %v804_v29 = vand.u32 2147483647, %v2269_v24  ;;  %v2277_v30 = vadd.f32 %v2263_v20, %v696_v28  ;;  %v756_v3 = vmax.f32 %v2269_v24, 0.0  ;;  %vm772_vm3 = vcmp.ne.f32.partialorder %v2269_v24, %v2269_v24 }
 0x256   : > { %v822_v31 = vsub.f32 0.0, %v806_v26  ;;  %v807_v35 = vand.u32 2147483647, %v2273_v27  ;;  %v1604_v43 = vpack.c.bf16 %v2273_v27, %v2266_v22  ;;  %v759_v26 = vmax.f32 %v2273_v27, 0.0 }
 0x257   : > { %v820_v32 = vsub.f32 0.0, %v804_v29  ;;  %v1601_v33 = vpack.c.bf16 %v2277_v30, %v2269_v24  ;;  %v805_v38 = vand.u32 2147483647, %v2277_v30  ;;  %vm775_vm5 = vcmp.ne.f32.partialorder %v2273_v27, %v2273_v27 }
 0x258   : > { %v840_v34 = vmul.f32 1.442695, %v822_v31  ;;  %v823_v44 = vsub.f32 0.0, %v807_v35  ;;  %vm773_vm7 = vcmp.ne.f32.partialorder %v2277_v30, %v2277_v30 }
 0x259   : > { %v836_v36 = vmul.f32 1.442695, %v820_v32  ;;  %v1555_v37 = vpop.f32.mrb[4].mxu1  ;;  %1602 = vmatpush3.bf16.msra.mxu0 %v1601_v33  ;;  %v821_v50 = vsub.f32 0.0, %v805_v38  ;;  %v757_v32 = vmax.f32 %v2277_v30, 0.0 }
 0x25a   : > { %1725 = vpow2.f32 %v840_v34  ;;  %v2284_v39 = vadd.f32 %v1555_v37, %v2263_v20  ;;  %v709_v40 = vpop.f32.mrb[5].mxu1  ;;  %1603 = vmatprep.subr.bf16.mxu0 %v1990_v17  ;;  %v842_v54 = vmul.f32 1.442695, %v823_v44 }
 0x25b   : > { %v2288_v41 = vadd.f32 %v2263_v20, %v709_v40  ;;  %v1556_v42 = vpop.f32.mrb[6].mxu1  ;;  %1727 = vpow2.f32 %v836_v36  ;;  %v838_v58 = vmul.f32 1.442695, %v821_v50 }
 0x25c   : > { %v810_v45 = vand.u32 2147483647, %v2284_v39  ;;  %v2294_v46 = vadd.f32 %v1556_v42, %v2263_v20  ;;  %v712_v47 = vpop.f32.mrb[7].mxu1  ;;  %1729 = vpow2.f32 %v842_v54  ;;  %v762_v36 = vmax.f32 %v2284_v39, 0.0 }
 0x25d   : > { %v808_v48 = vand.u32 2147483647, %v2288_v41  ;;  %v2298_v49 = vadd.f32 %v2263_v20, %v712_v47  ;;  %1605 = vmatpush3.bf16.msra.mxu0 %v1604_v43  ;;  %1731 = vpow2.f32 %v838_v58  ;;  %vm778_vm9 = vcmp.ne.f32.partialorder %v2284_v39, %v2284_v39 }
 0x25e   : > { %v811_v51 = vand.u32 2147483647, %v2294_v46  ;;  %1606 = vmatprep.subr.bf16.mxu0 %v1990_v17  ;;  %v826_v55 = vsub.f32 0.0, %v810_v45  ;;  %v1610_v2 = vpack.c.bf16 %v2294_v46, %v2284_v39  ;;  %vm779_vm11 = vcmp.ne.f32.partialorder %v2294_v46, %v2294_v46 }
 0x25f   : > { %v809_v52 = vand.u32 2147483647, %v2298_v49  ;;  %v1607_v53 = vpack.c.bf16 %v2298_v49, %v2288_v41  ;;  %v824_v56 = vsub.f32 0.0, %v808_v48  ;;  %vm776_vm15 = vcmp.ne.f32.partialorder %v2288_v41, %v2288_v41 }
 0x260   : > { %v827_v59 = vsub.f32 0.0, %v811_v51  ;;  %v848_v5 = vmul.f32 1.442695, %v826_v55  ;;  %vm777_vm0 = vcmp.ne.f32.partialorder %v2298_v49, %v2298_v49 }
 0x261   : > { %v1559_v57 = vpop.f32.mrb[8].mxu1  ;;  %1608 = vmatpush3.bf16.msra.mxu0 %v1607_v53  ;;  %v825_v63 = vsub.f32 0.0, %v809_v52  ;;  %v844_v9 = vmul.f32 1.442695, %v824_v56 }
 0x262   : > { %v2306_v60 = vadd.f32 %v1559_v57, %v2263_v20  ;;  %v725_v61 = vpop.f32.mrb[9].mxu1  ;;  %1609 = vmatprep.subr.bf16.mxu0 %v1990_v17  ;;  %v850_v13 = vmul.f32 1.442695, %v827_v59 }
 0x263   : > { %v2311_v0 = vadd.f32 %v2263_v20, %v725_v61  ;;  %v1560_v1 = vpop.f32.mrb[10].mxu1  ;;  %v846_v18 = vmul.f32 1.442695, %v825_v63 }
 0x264   : > { %v2316_v4 = vpop.eup %1725  ;;  %v814_v6 = vand.u32 2147483647, %v2306_v60  ;;  %v2320_v7 = vadd.f32 %v1560_v1, %v2263_v20  ;;  %v728_v8 = vpop.f32.mrb[11].mxu1 }
 0x265   : > { %v812_v10 = vand.u32 2147483647, %v2311_v0  ;;  %v2324_v11 = vadd.f32 %v2263_v20, %v728_v8  ;;  %1611 = vmatpush3.bf16.msra.mxu0 %v1610_v2  ;;  %v886_v12 = vadd.f32 1.0, %v2316_v4  ;;  %v2329_v16 = vpop.eup %1727  ;;  %v889_v25 = vmul.f32 -0.5, %v2316_v4 }
 0x266   : > { %v830_v14 = vsub.f32 0.0, %v814_v6  ;;  %v815_v15 = vand.u32 2147483647, %v2320_v7  ;;  %1612 = vmatprep.subr.bf16.mxu0 %v1990_v17  ;;  %v868_v35 = vadd.f32 1.0, %v2329_v16  ;;  %v1616_v42 = vpack.c.bf16 %v2320_v7, %v2306_v60  ;;  %v2356_v53 = vpop.eup %1729 }
 0x267   : > { %v813_v19 = vand.u32 2147483647, %v2324_v11  ;;  %v1613_v21 = vpack.c.bf16 %v2324_v11, %v2311_v0  ;;  %1733 = vlog2.f32 %v886_v12  ;;  %v828_v23 = vsub.f32 0.0, %v812_v10  ;;  %v2366_v61 = vpop.eup %1731 }
 0x268   : > { %1735 = vpow2.f32 %v848_v5  ;;  %v856_v28 = vmul.f32 1.442695, %v830_v14  ;;  %v831_v29 = vsub.f32 0.0, %v815_v15  ;;  %v890_v48 = vadd.f32 1.0, %v889_v25 }
 0x269   : > { %1737 = vpow2.f32 %v844_v9  ;;  %v1563_v31 = vpop.f32.mrb[12].mxu1  ;;  %1614 = vmatpush3.bf16.msra.mxu0 %v1613_v21  ;;  %v829_v37 = vsub.f32 0.0, %v813_v19  ;;  %v852_v43 = vmul.f32 1.442695, %v828_v23  ;;  %v892_v56 = vand.u32 2147483647, %v2316_v4 }
 0x26a   : > { %1739 = vpow2.f32 %v850_v13  ;;  %v2338_v33 = vadd.f32 %v1563_v31, %v2263_v20  ;;  %v741_v34 = vpop.f32.mrb[13].mxu1  ;;  %1615 = vmatprep.subr.bf16.mxu0 %v1990_v17  ;;  %v858_v50 = vmul.f32 1.442695, %v831_v29  ;;  %v871_v1 = vmul.f32 -0.5, %v2329_v16  ;;  %v1159_v31 = vld [vmem:[%s2731_s4] sm:$0xff] }
 0x26b   : > { %1741 = vpow2.f32 %v846_v18  ;;  %v2344_v38 = vadd.f32 %v2263_v20, %v741_v34  ;;  %v1564_v40 = vpop.f32.mrb[14].mxu1  ;;  %v854_v57 = vmul.f32 1.442695, %v829_v37  ;;  %v763_v2 = vmax.f32 %v2294_v46, 0.0 }
 0x26c   : > { %v818_v44 = vand.u32 2147483647, %v2338_v33  ;;  %v2350_v45 = vadd.f32 %v1564_v40, %v2263_v20  ;;  %v744_v47 = vpop.f32.mrb[15].mxu1  ;;  %1743 = vpow2.f32 %v856_v28  ;;  %v891_v8 = vmul.f32 %v2316_v4, %v890_v48 }
 0x26d   : > { %v816_v51 = vand.u32 2147483647, %v2344_v38  ;;  %v2354_v52 = vadd.f32 %v2263_v20, %v744_v47  ;;  %1617 = vmatpush3.bf16.msra.mxu0 %v1616_v42  ;;  %1745 = vlog2.f32 %v868_v35  ;;  %v760_v9 = vmax.f32 %v2288_v41, 0.0 }
 0x26e   : > { %v834_v54 = vsub.f32 0.0, %v818_v44  ;;  %v819_v55 = vand.u32 2147483647, %v2350_v45  ;;  %1618 = vmatprep.subr.bf16.mxu0 %v1990_v17  ;;  %1747 = vpow2.f32 %v852_v43  ;;  %v895_v15 = vadd.f32 1.0, %v2356_v53 }
 0x26f   : > { %v832_v58 = vsub.f32 0.0, %v816_v51  ;;  %v817_v59 = vand.u32 2147483647, %v2354_v52  ;;  %v1619_v20 = vpack.c.bf16 %v2354_v52, %v2344_v38  ;;  %1749 = vpow2.f32 %v858_v50 }
 0x270   : > { %v864_v63 = vmul.f32 1.442695, %v834_v54  ;;  %v835_v12 = vsub.f32 0.0, %v819_v55  ;;  %1751 = vpow2.f32 %v854_v57  ;;  %v1622_v19 = vpack.c.bf16 %v2350_v45, %v2338_v33 }
 0x271   : > { %v1734_v5 = vpop.eup %1733  ;;  %v860_v6 = vmul.f32 1.442695, %v832_v58  ;;  %1620 = vmatpush3.bf16.msra.mxu0 %v1619_v20  ;;  %v833_v13 = vsub.f32 0.0, %v817_v59  ;;  %vm893_vm2 = vcmp.lt.f32.partialorder %v892_v56, 0.0004427343  ;;  %v877_v4 = vadd.f32 1.0, %v2366_v61 }
 0x272   : > { %v2372_v10 = vpop.eup %1735  ;;  %1621 = vmatprep.subr.bf16.mxu0 %v1990_v17  ;;  %v888_v14 = vmul.f32 0.6931472, %v1734_v5  ;;  %1753 = vpow2.f32 %v864_v63  ;;  %v872_v25 = vadd.f32 1.0, %v871_v1  ;;  %v874_v28 = vand.u32 2147483647, %v2329_v16 }
 0x273   : > { %v2376_v18 = vpop.eup %1737  ;;  %1755 = vpow2.f32 %v860_v6  ;;  %v898_v34 = vmul.f32 -0.5, %v2356_v53  ;;  %v922_v35 = vadd.f32 1.0, %v2372_v10  ;;  %v866_v37 = vmul.f32 1.442695, %v835_v12 }
 0x274   : > { %v2381_v21 = vpop.eup %1739  ;;  %v894_v23 = vsel %vm893_vm2, %v891_v8, %v888_v14  ;;  %v862_v40 = vmul.f32 1.442695, %v833_v13  ;;  %1757 = vlog2.f32 %v895_v15  ;;  %v761_v42 = vmax.f32 %v2298_v49, 0.0 }
 0x275   : > { %v2384_v17 = vpop.eup %1741  ;;  %1623 = vmatpush3.bf16.msra.mxu0 %v1622_v19  ;;  %v1014_v29 = vadd.f32 %v894_v23, %v758_v62  ;;  %1759 = vlog2.f32 %v877_v4  ;;  %v880_v44 = vmul.f32 -0.5, %v2366_v61  ;;  %v931_v47 = vadd.f32 1.0, %v2381_v21 }
 0x276   : > { %v2396_v43 = vpop.eup %1743  ;;  %v873_v50 = vmul.f32 %v2329_v16, %v872_v25  ;;  %vm2405_vm4 = vcmp.lt.f32.partialorder %v874_v28, 0.0004427343  ;;  %v901_v54 = vand.u32 2147483647, %v2356_v53  ;;  %1761 = vlog2.f32 %v922_v35 }
 0x277   : > { %v1030_v62 = vsel %vm774_vm1, %v2266_v22, %v1014_v29  ;;  %v1746_v48 = vpop.eup %1745  ;;  %v899_v56 = vadd.f32 1.0, %v898_v34  ;;  %v925_v57 = vmul.f32 -0.5, %v2372_v10  ;;  %1763 = vlog2.f32 %v931_v47 }
 0x278   : > { %1059 = vperm.xlu1 %1699, %v1030_v62   ;;  %1598 = vmatmul.mubr.f32.vlgmr.msra.gmra.mrb[16].mxu0 %v1159_v31  ;;  %v870_v55 = vmul.f32 0.6931472, %v1746_v48  ;;  %v2411_v58 = vpop.eup %1747  ;;  %1765 = vpow2.f32 %v866_v37  ;;  %v883_v59 = vand.u32 2147483647, %v2366_v61  ;;  %v934_v20 = vmul.f32 -0.5, %v2381_v21 }
 0x279   : > { %v904_v16 = vadd.f32 1.0, %v2376_v18  ;;  %v2416_v63 = vpop.eup %1749  ;;  %1767 = vpow2.f32 %v862_v40  ;;  %v881_v5 = vadd.f32 1.0, %v880_v44  ;;  %v913_v6 = vadd.f32 1.0, %v2384_v17 }
 0x27a   : > { %v876_v1 = vsel %vm2405_vm4, %v873_v50, %v870_v55  ;;  %v928_v12 = vand.u32 2147483647, %v2372_v10  ;;  %v937_v13 = vand.u32 2147483647, %v2381_v21  ;;  %v2425_v14 = vpop.eup %1751  ;;  %vm2429_vm6 = vcmp.lt.f32.partialorder %v901_v54, 0.0004427343 }
 0x27b   : > { %v1012_v8 = vadd.f32 %v876_v1, %v756_v3  ;;  %1769 = vlog2.f32 %v904_v16  ;;  %v926_v19 = vadd.f32 1.0, %v925_v57  ;;  %v907_v4 = vmul.f32 -0.5, %v2376_v18 }
 0x27c   : > { %1771 = vlog2.f32 %v913_v6  ;;  %v2434_v23 = vpop.eup %1753  ;;  %v900_v25 = vmul.f32 %v2356_v53, %v899_v56  ;;  %v935_v28 = vadd.f32 1.0, %v934_v20  ;;  %v958_v29 = vadd.f32 1.0, %v2396_v43 }
 0x27d   : > { %v1028_v3 = vsel %vm772_vm3, %v2269_v24, %v1012_v8  ;;  %v2444_v31 = vpop.eup %1755  ;;  %v882_v34 = vmul.f32 %v2366_v61, %v881_v5  ;;  %vm2447_vm8 = vcmp.lt.f32.partialorder %v883_v59, 0.0004427343  ;;  %v910_v37 = vand.u32 2147483647, %v2376_v18 }
 0x27e   : > { %1049 = vperm.xlu0 %1700, %v1028_v3   ;;  %v916_v40 = vmul.f32 -0.5, %v2384_v17  ;;  %v1758_v53 = vpop.eup %1757  ;;  %vm2455_vm10 = vcmp.lt.f32.partialorder %v928_v12, 0.0004427343  ;;  %vm2461_vm12 = vcmp.lt.f32.partialorder %v937_v13, 0.0004427343  ;;  %1773 = vlog2.f32 %v958_v29 }
 0x27f   : > { %v967_v44 = vadd.f32 1.0, %v2416_v63  ;;  %v1760_v47 = vpop.eup %1759  ;;  %v897_v48 = vmul.f32 0.6931472, %v1758_v53  ;;  %v927_v50 = vmul.f32 %v2372_v10, %v926_v19  ;;  %v908_v51 = vadd.f32 1.0, %v907_v4 }
 0x280   : > { %v919_v54 = vand.u32 2147483647, %v2384_v17  ;;  %v1762_v55 = vpop.eup %1761  ;;  %v879_v56 = vmul.f32 0.6931472, %v1760_v47  ;;  %v936_v57 = vmul.f32 %v2381_v21, %v935_v28  ;;  %v961_v59 = vmul.f32 -0.5, %v2396_v43 }
 0x281   : > { %1775 = vlog2.f32 %v967_v44  ;;  %v1764_v20 = vpop.eup %1763  ;;  %v903_v16 = vsel %vm2429_vm6, %v900_v25, %v897_v48  ;;  %v924_v1 = vmul.f32 0.6931472, %v1762_v55  ;;  %vm2472_vm13 = vcmp.lt.f32.partialorder %v910_v37, 0.0004427343 }
 0x282   : > { %v917_v10 = vadd.f32 1.0, %v916_v40  ;;  %v2476_v6 = vpop.eup %1765  ;;  %v1015_v8 = vadd.f32 %v903_v16, %v759_v26  ;;  %v885_v21 = vsel %vm2447_vm8, %v882_v34, %v879_v56  ;;  %v933_v12 = vmul.f32 0.6931472, %v1764_v20 }
 0x283   : > { %v970_v13 = vmul.f32 -0.5, %v2416_v63  ;;  %v2483_v19 = vpop.eup %1767  ;;  %v1013_v15 = vadd.f32 %v885_v21, %v757_v32  ;;  %v930_v4 = vsel %vm2455_vm10, %v927_v50, %v924_v1  ;;  %v909_v3 = vmul.f32 %v2376_v18, %v908_v51 }
 0x284   : > { %vm2490_vm14 = vcmp.lt.f32.partialorder %v919_v54, 0.0004427343  ;;  %v1031_v28 = vsel %vm775_vm5, %v2273_v27, %v1015_v8  ;;  %v1018_v29 = vadd.f32 %v930_v4, %v762_v36  ;;  %v939_v32 = vsel %vm2461_vm12, %v936_v57, %v933_v12 }
 0x285   : > { %v1770_v26 = vpop.eup %1769  ;;  %v962_v18 = vadd.f32 1.0, %v961_v59  ;;  %1064 = vperm.xlu1 %1699, %v1031_v28   ;;  %v1029_v35 = vsel %vm773_vm7, %v2277_v30, %v1013_v15  ;;  %v1019_v37 = vadd.f32 %v939_v32, %v763_v2  ;;  %v940_v36 = vadd.f32 1.0, %v2411_v58 }
 0x286   : > { %v1772_v34 = vpop.eup %1771  ;;  %v906_v40 = vmul.f32 0.6931472, %v1770_v26  ;;  %1054 = vperm.xlu0 %1700, %v1029_v35   ;;  %v918_v62 = vmul.f32 %v2384_v17, %v917_v10  ;;  %v964_v61 = vand.u32 2147483647, %v2396_v43  ;;  %v971_v44 = vadd.f32 1.0, %v970_v13 }
 0x287   : > { %v915_v53 = vmul.f32 0.6931472, %v1772_v34  ;;  %v1034_v47 = vsel %vm778_vm9, %v2284_v39, %v1018_v29  ;;  %v1035_v2 = vsel %vm779_vm11, %v2294_v46, %v1019_v37  ;;  %1777 = vlog2.f32 %v940_v36 }
 0x288   : > { %v912_v48 = vsel %vm2472_vm13, %v909_v3, %v906_v40  ;;  %v1774_v50 = vpop.eup %1773  ;;  %v963_v51 = vmul.f32 %v2396_v43, %v962_v18  ;;  %v973_v54 = vand.u32 2147483647, %v2416_v63  ;;  %v943_v55 = vmul.f32 -0.5, %v2411_v58 }
 0x289   : > { %v921_v17 = vsel %vm2490_vm14, %v918_v62, %v915_v53  ;;  %1084 = vperm.xlu1 %1699, %v1035_v2   ;;  %v1016_v56 = vadd.f32 %v912_v48, %v760_v9  ;;  %v960_v59 = vmul.f32 0.6931472, %v1774_v50  ;;  %v949_v20 = vadd.f32 1.0, %v2425_v14 }
 0x28a   : > { %v1017_v57 = vadd.f32 %v921_v17, %v761_v42  ;;  %1079 = vperm.xlu0 %1700, %v1034_v47   ;;  %v766_v43 = vmax.f32 %v2306_v60, 0.0  ;;  %vm965_vm1 = vcmp.lt.f32.partialorder %v964_v61, 0.0004427343  ;;  %v767_v1 = vmax.f32 %v2320_v7, 0.0 }
 0x28b   : > { %v1776_v16 = vpop.eup %1775  ;;  %v966_v5 = vsel %vm965_vm1, %v963_v51, %v960_v59  ;;  %v972_v9 = vmul.f32 %v2416_v63, %v971_v44  ;;  %1779 = vlog2.f32 %v949_v20  ;;  %vm974_vm2 = vcmp.lt.f32.partialorder %v973_v54, 0.0004427343 }
 0x28c   : > { %v969_v10 = vmul.f32 0.6931472, %v1776_v16  ;;  %v1033_v42 = vsel %vm777_vm0, %v2298_v49, %v1017_v57  ;;  %v1022_v8 = vadd.f32 %v966_v5, %v766_v43  ;;  %v944_v21 = vadd.f32 1.0, %v943_v55 }
 0x28d   : > { %v1032_v12 = vsel %vm776_vm15, %v2288_v41, %v1016_v56  ;;  %1074 = vperm.xlu1 %1699, %v1033_v42   ;;  %v952_v15 = vmul.f32 -0.5, %v2425_v14  ;;  %v976_v4 = vadd.f32 1.0, %v2444_v31  ;;  %vm782_vm3 = vcmp.ne.f32.partialorder %v2306_v60, %v2306_v60 }
 0x28e   : > { %v975_v13 = vsel %vm974_vm2, %v972_v9, %v969_v10  ;;  %1069 = vperm.xlu0 %1700, %v1032_v12   ;;  %v1038_v3 = vsel %vm782_vm3, %v2306_v60, %v1022_v8  ;;  %vm783_vm4 = vcmp.ne.f32.partialorder %v2320_v7, %v2320_v7  ;;  %v946_v25 = vand.u32 2147483647, %v2411_v58 }
 0x28f   : > { %v1023_v63 = vadd.f32 %v975_v13, %v767_v1  ;;  %1781 = vlog2.f32 %v976_v4  ;;  %v985_v28 = vadd.f32 1.0, %v2483_v19  ;;  %v945_v32 = vmul.f32 %v2411_v58, %v944_v21 }
 0x290   : > { %v953_v18 = vadd.f32 1.0, %v952_v15  ;;  %v955_v34 = vand.u32 2147483647, %v2425_v14  ;;  %v979_v37 = vmul.f32 -0.5, %v2444_v31  ;;  %v994_v40 = vadd.f32 1.0, %v2434_v23 }
 0x291   : > { %v1039_v26 = vsel %vm783_vm4, %v2320_v7, %v1023_v63  ;;  %v1778_v29 = vpop.eup %1777  ;;  %1783 = vlog2.f32 %v985_v28  ;;  %v764_v36 = vmax.f32 %v2311_v0, 0.0  ;;  %vm947_vm5 = vcmp.lt.f32.partialorder %v946_v25, 0.0004427343 }
 0x292   : > { %1104 = vperm.xlu1 %1699, %v1039_v26   ;;  %1099 = vperm.xlu0 %1700, %v1038_v3   ;;  %v942_v35 = vmul.f32 0.6931472, %v1778_v29  ;;  %vm780_vm6 = vcmp.ne.f32.partialorder %v2311_v0, %v2311_v0  ;;  %1785 = vlog2.f32 %v994_v40  ;;  %v765_v61 = vmax.f32 %v2324_v11, 0.0 }
 0x293   : > { %v988_v44 = vmul.f32 -0.5, %v2483_v19  ;;  %v1003_v47 = vadd.f32 1.0, %v2476_v6  ;;  %v954_v48 = vmul.f32 %v2425_v14, %v953_v18  ;;  %vm956_vm7 = vcmp.lt.f32.partialorder %v955_v34, 0.0004427343 }
 0x294   : > { %v948_v53 = vsel %vm947_vm5, %v945_v32, %v942_v35  ;;  %v980_v50 = vadd.f32 1.0, %v979_v37  ;;  %v982_v51 = vand.u32 2147483647, %v2444_v31  ;;  %v997_v54 = vmul.f32 -0.5, %v2434_v23 }
 0x295   : > { %v1780_v62 = vpop.eup %1779  ;;  %v1020_v58 = vadd.f32 %v948_v53, %v764_v36  ;;  %1787 = vlog2.f32 %v1003_v47  ;;  %vm781_vm8 = vcmp.ne.f32.partialorder %v2324_v11, %v2324_v11  ;;  %v989_v59 = vadd.f32 1.0, %v988_v44 }
 0x296   : > { %v951_v2 = vmul.f32 0.6931472, %v1780_v62  ;;  %v981_v14 = vmul.f32 %v2444_v31, %v980_v50  ;;  %v991_v16 = vand.u32 2147483647, %v2483_v19  ;;  %v1006_v43 = vmul.f32 -0.5, %v2476_v6 }
 0x297   : > { %v1036_v17 = vsel %vm780_vm6, %v2311_v0, %v1020_v58  ;;  %v768_v5 = vmax.f32 %v2344_v38, 0.0  ;;  %vm983_vm9 = vcmp.lt.f32.partialorder %v982_v51, 0.0004427343  ;;  %v998_v10 = vadd.f32 1.0, %v997_v54 }
 0x298   : > { %1089 = vperm.xlu0 %1700, %v1036_v17   ;;  %v957_v55 = vsel %vm956_vm7, %v954_v48, %v951_v2  ;;  %v1000_v8 = vand.u32 2147483647, %v2434_v23  ;;  %vm784_vm10 = vcmp.ne.f32.partialorder %v2344_v38, %v2344_v38  ;;  %v990_v12 = vmul.f32 %v2483_v19, %v989_v59 }
 0x299   : > { %v1782_v56 = vpop.eup %1781  ;;  %v1021_v57 = vadd.f32 %v957_v55, %v765_v61  ;;  %v769_v15 = vmax.f32 %v2354_v52, 0.0  ;;  %vm992_vm11 = vcmp.lt.f32.partialorder %v991_v16, 0.0004427343  ;;  %v1007_v4 = vadd.f32 1.0, %v1006_v43 }
 0x29a   : > { %v978_v20 = vmul.f32 0.6931472, %v1782_v56  ;;  %v1009_v63 = vand.u32 2147483647, %v2476_v6  ;;  %v999_v28 = vmul.f32 %v2434_v23, %v998_v10  ;;  %v770_v32 = vmax.f32 %v2338_v33, 0.0 }
 0x29b   : > { %v1037_v1 = vsel %vm781_vm8, %v2324_v11, %v1021_v57  ;;  %v1784_v9 = vpop.eup %1783  ;;  %vm1001_vm12 = vcmp.lt.f32.partialorder %v1000_v8, 0.0004427343  ;;  %vm785_vm13 = vcmp.ne.f32.partialorder %v2354_v52, %v2354_v52  ;;  %v1008_v40 = vmul.f32 %v2476_v6, %v1007_v4 }
 0x29c   : > { %1094 = vperm.xlu1 %1699, %v1037_v1   ;;  %v984_v42 = vsel %vm983_vm9, %v981_v14, %v978_v20  ;;  %v987_v31 = vmul.f32 0.6931472, %v1784_v9  ;;  %v1786_v13 = vpop.eup %1785  ;;  %vm786_vm14 = vcmp.ne.f32.partialorder %v2338_v33, %v2338_v33  ;;  %v771_v23 = vmax.f32 %v2350_v45, 0.0 }
 0x29d   : > { %v1024_v21 = vadd.f32 %v984_v42, %v768_v5  ;;  %v996_v26 = vmul.f32 0.6931472, %v1786_v13  ;;  %vm1010_vm15 = vcmp.lt.f32.partialorder %v1009_v63, 0.0004427343  ;;  %vm787_vm0 = vcmp.ne.f32.partialorder %v2350_v45, %v2350_v45 }
 0x29e   : > { %v993_v25 = vsel %vm992_vm11, %v990_v12, %v987_v31  ;;  %v1044_v61 = vlaneseq }
 0x29f   : > { %v1040_v3 = vsel %vm784_vm10, %v2344_v38, %v1024_v21  ;;  %v1025_v29 = vadd.f32 %v993_v25, %v769_v15  ;;  %v1788_v18 = vpop.eup %1787  ;;  %v1002_v19 = vsel %vm1001_vm12, %v999_v28, %v996_v26 }
 0x2a0   : > { %1109 = vperm.xlu0 %1700, %v1040_v3   ;;  %v1026_v35 = vadd.f32 %v1002_v19, %v770_v32  ;;  %v1005_v37 = vmul.f32 0.6931472, %v1788_v18  ;;  %v1045_v6 = vand.u32 127, %v1044_v61 }
 0x2a1   : > { %v1041_v34 = vsel %vm785_vm13, %v2354_v52, %v1025_v29 }
 0x2a2   : > { %1114 = vperm.xlu1 %1699, %v1041_v34   ;;  %v1042_v36 = vsel %vm786_vm14, %v2338_v33, %v1026_v35  ;;  %v1011_v53 = vsel %vm1010_vm15, %v1008_v40, %v1005_v37  ;;  %vm1046_vm1 = vcmp.eq.s32.totalorder %v1045_v6, 1 }
 0x2a3   : > { %v1027_v62 = vadd.f32 %v1011_v53, %v771_v23 }
 0x2a4   : > { %1119 = vperm.xlu0 %1700, %v1042_v36  }
 0x2a5   : > { %v1043_v58 = vsel %vm787_vm0, %v2350_v45, %v1027_v62 }
 0x2a6   : > { %1124 = vperm.xlu1 %1699, %v1043_v58  }
 0x2f7   : > { %v1060_v44 = vpop.permute.xlu1 %1059 }
 0x2f8   : > { %v1129_v47 = vsel %vm1046_vm1, %v1060_v44, %v2266_v22 }
 0x2f9   : > { %1145 = vst [vmem:[%s2597_s15 + $0x10] sm:$0xff] %v1129_v47 }
 0x2fd   : > { %v1050_v2 = vpop.permute.xlu0 %1049 }
 0x2fe   : > { %v1127_v48 = vsel %vm1046_vm1, %v1050_v2, %v2269_v24 }
 0x2ff   : > { %1143 = vst [vmem:[%s2597_s15] sm:$0xff] %v1127_v48 }
 0x304   : > { %v1065_v50 = vpop.permute.xlu1 %1064 }
 0x305   : > { %v1130_v17 = vsel %vm1046_vm1, %v1065_v50, %v2273_v27  ;;  %v1055_v22 = vpop.permute.xlu0 %1054 }
 0x306   : > { %1146 = vst [vmem:[%s2597_s15 + $0x18] sm:$0xff] %v1130_v17  ;;  %v1128_v51 = vsel %vm1046_vm1, %v1055_v22, %v2277_v30 }
 0x307   : > { %1144 = vst [vmem:[%s2597_s15 + $0x8] sm:$0xff] %v1128_v51 }
 0x308   : > { %v1085_v54 = vpop.permute.xlu1 %1084 }
 0x309   : > { %v1080_v55 = vpop.permute.xlu0 %1079  ;;  %v1134_v24 = vsel %vm1046_vm1, %v1085_v54, %v2294_v46 }
 0x30a   : > { %v1133_v56 = vsel %vm1046_vm1, %v1080_v55, %v2284_v39  ;;  %1150 = vst [vmem:[%s2597_s15 + $0x38] sm:$0xff] %v1134_v24 }
 0x30b   : > { %1149 = vst [vmem:[%s2597_s15 + $0x30] sm:$0xff] %v1133_v56 }
 0x30c   : > { %v1075_v27 = vpop.permute.xlu1 %1074 }
 0x30d   : > { %v1070_v57 = vpop.permute.xlu0 %1069  ;;  %v1132_v30 = vsel %vm1046_vm1, %v1075_v27, %v2298_v49 }
 0x30e   : > { %v1131_v59 = vsel %vm1046_vm1, %v1070_v57, %v2288_v41  ;;  %1148 = vst [vmem:[%s2597_s15 + $0x28] sm:$0xff] %v1132_v30 }
 0x30f   : > { %1147 = vst [vmem:[%s2597_s15 + $0x20] sm:$0xff] %v1131_v59 }
 0x311   : > { %v1105_v20 = vpop.permute.xlu1 %1104  ;;  %v1100_v46 = vpop.permute.xlu0 %1099 }
 0x312   : > { %v1138_v39 = vsel %vm1046_vm1, %v1105_v20, %v2320_v7  ;;  %v1137_v14 = vsel %vm1046_vm1, %v1100_v46, %v2306_v60 }
 0x313   : > { %1154 = vst [vmem:[%s2597_s15 + $0x58] sm:$0xff] %v1138_v39  ;;  %1153 = vst [vmem:[%s2597_s15 + $0x50] sm:$0xff] %v1137_v14 }
 0x317   : > { %v1090_v49 = vpop.permute.xlu0 %1089 }
 0x318   : > { %v1135_v41 = vsel %vm1046_vm1, %v1090_v49, %v2311_v0 }
 0x319   : > { %1151 = vst [vmem:[%s2597_s15 + $0x40] sm:$0xff] %v1135_v41 }
 0x31b   : > { %v1095_v16 = vpop.permute.xlu1 %1094 }
 0x31c   : > { %v1136_v43 = vsel %vm1046_vm1, %v1095_v16, %v2324_v11 }
 0x31d   : > { %1152 = vst [vmem:[%s2597_s15 + $0x48] sm:$0xff] %v1136_v43 }
 0x31f   : > { %v1110_v7 = vpop.permute.xlu0 %1109 }
 0x320   : > { %v1139_v60 = vsel %vm1046_vm1, %v1110_v7, %v2344_v38 }
 0x321   : > { %1155 = vst [vmem:[%s2597_s15 + $0x60] sm:$0xff] %v1139_v60  ;;  %v1115_v1 = vpop.permute.xlu1 %1114 }
 0x322   : > { %v1140_v5 = vsel %vm1046_vm1, %v1115_v1, %v2354_v52 }
 0x323   : > { %1156 = vst [vmem:[%s2597_s15 + $0x68] sm:$0xff] %v1140_v5  ;;  %v1120_v0 = vpop.permute.xlu0 %1119 }
 0x324   : > { %v1141_v11 = vsel %vm1046_vm1, %v1120_v0, %v2338_v33 }
 0x325   : > { %1157 = vst [vmem:[%s2597_s15 + $0x70] sm:$0xff] %v1141_v11  ;;  %v1125_v38 = vpop.permute.xlu1 %1124 }
 0x326   : > { %v1142_v52 = vsel %vm1046_vm1, %v1125_v38, %v2350_v45 }
 0x327   : > { %1158 = vst [vmem:[%s2597_s15 + $0x78] sm:$0xff] %v1142_v52 }
 0x328   : > { %1890 = shalt.err (!%p1887_p6)
}
 0x329   : > { %s1891_s17 = scalar_lea.hbm %s2647_s0, 2048  ;;  %s1895_s20 = scalar_lea.hbm %s2732_s5, 4096 }
 0x32a   : > { %p1892_p8 = scmp.ne.s32.totalorder %s2647_s0, %s1891_s17  ;;  %p1896_p4 = scmp.lt.u32.totalorder %s2647_s0, %s2732_s5 }
 0x32b   : > { %p1897_p11 = scmp.lt.u32.totalorder %s1895_s20, %s1891_s17  ;;  %p1899_p3 = scmp.lt.u32.totalorder %s1891_s17, %s2647_s0 }
 0x32c   : > { %p1893_p10 = pnand %p1892_p8, %p2127_p12 }
 0x32d   : > { %p1898_p13 = por %p1897_p11, %p1896_p4 }
 0x32e   : > { %p1894_p0 = pneg %p1893_p10 }
 0x32f   : > { %p1900_p7 = por %p1899_p3, %p1898_p13 }
 0x331   : > { %p1901_p9 = pnand %p1900_p7, %p1894_p0 }
 0x333   : > { %1904 = shalt.err (!%p1901_p9)
}
 0x334   : > { %s1995_s8 = smov 128   ;;  %s1996_s26 = smov 8  }
 0x335   : > { %1632 = dma.vmem_to_hbm [thread:$0]  (%p2127_p12), %s2649_s16, 2048, %s2647_s0, %s1232_s18, %s1995_s8, %s1995_s8, %s1996_s26  }
 0x336   : > { %s1415_s15 = sshll.u32 %s2219_s9, 3  ;;  %s1446_s11 = sshll.u32 %s2054_s25, 7 }
 0x337   : > { %s334_s23 = scalar_lea.vmem [#allocation9], %s1415_s15  ;;  %s2685_s19 = scalar_lea.hbm %s2733_s6, %s1446_s11 }
 0x338   : > { %s1266_s7 = sshll.u32 %s334_s23, 4  ;;  %s1237_s29 = scalar_lea.sflag [#allocation10], %s2219_s9  ;;  %s2680_s7 = int_to_ptr.vmem [resolvable:$true] %s1266_s7 }
 0x339   : > { %s1905_s17 = scalar_lea.vmem %s2680_s7, 128  ;;  %s1997_s25 = smov [#allocation9]  }
 0x33a   : > { %p1906_p1 = scmp.ne.s32.totalorder %s2680_s7, %s1905_s17  ;;  %s1909_s16 = sshll.u32 %s1997_s25, 4  ;;  %s1910_s16 = int_to_ptr.vmem [resolvable:$false] %s1909_s16 }
 0x33b   : > { %s1911_s0 = scalar_lea.vmem %s1910_s16, 256  ;;  %p1912_p6 = scmp.lt.s32.totalorder %s2680_s7, %s1910_s16 }
 0x33c   : > { %p1907_p5 = pnand %p1906_p1, %p2127_p12  ;;  %p1913_p8 = scmp.lt.s32.totalorder %s1911_s0, %s1905_s17 }
 0x33e   : > { %p1908_p2 = pneg %p1907_p5  ;;  %p1914_p10 = por %p1913_p8, %p1912_p6 }
 0x340   : > { %p1915_p0 = pnand %p1914_p10, %p1908_p2 }
 0x34b   : > { %v1226_v33 = vpop.f32.mrb[16].mxu0 }
 0x34c   : > { %1230 = vst [vmem:[%s334_s23] sm:$0xff] %v1226_v33  ;;  %v1599_v45 = vpop.f32.mrb[17].mxu0 }
 0x34d   : > { %1918 = shalt.err (!%p1915_p0)
}
 0x34e   : > { %s1919_s9 = scalar_lea.hbm %s2685_s19, 128  ;;  %s1923_s2 = scalar_lea.hbm %s2733_s6, 256 }
 0x34f   : > { %p1920_p4 = scmp.ne.s32.totalorder %s2685_s19, %s1919_s9  ;;  %p1924_p3 = scmp.lt.u32.totalorder %s2685_s19, %s2733_s6 }
 0x350   : > { %p1925_p7 = scmp.lt.u32.totalorder %s1923_s2, %s1919_s9  ;;  %p1927_p1 = scmp.lt.u32.totalorder %s1919_s9, %s2685_s19 }
 0x351   : > { %p1921_p11 = pnand %p1920_p4, %p2127_p12 }
 0x352   : > { %p1926_p9 = por %p1925_p7, %p1924_p3 }
 0x353   : > { %p1922_p13 = pneg %p1921_p11 }
 0x354   : > { %p1928_p5 = por %p1927_p1, %p1926_p9 }
 0x356   : > { %p1929_p2 = pnand %p1928_p5, %p1922_p13 }
 0x358   : > { %1932 = shalt.err (!%p1929_p2)
}
 0x359   : > { %1633 = dma.vmem_to_hbm [thread:$0]  (%p2127_p12), %s2680_s7, 128, %s2685_s19, %s1237_s29  }
 0x35a PF: > { %s1278_s10 = sand.u32 1, %s1971_s21   ;;  %p2778_p6 = scmp.ne.s32.totalorder %s2748_s28, 0 }
 0x35b   : > { %p2779_p8 = scmp.ge.s32.totalorder %s1983_s24, 2  ;;  %s1279_s8 = scalar_lea.sflag [#allocation4], %s1278_s10 }
 0x35d   : > { %p1648_p10 = pnand %p2779_p8, %p2778_p6 }
 0x35f   : > { %1962 = dma.done.wait (!%p1648_p10), %s1279_s8, 2048  }
 0x360   : > { %1964 = vsyncadd (!%p1648_p10), %s1279_s8, 4294965248  ;;  %s1288_s26 = scalar_lea.sflag [#allocation10], %s1278_s10 }
 0x361   : > { %1966 = dma.done.wait (!%p1648_p10), %s1288_s26, 128  }
 0x362   : > { %1968 = vsyncadd (!%p1648_p10), %s1288_s26, 4294967168  ;;  %s2780_s24 = sld [smem:[#allocation17_spill]]  ;;  %s2781_s14 = sld [smem:[#allocation16_spill]] }
 0x363   : > { %s2782_s23 = sld [smem:[#allocation18_spill]]  ;;  %s2783_s21 = smov %s1975_s22 }
 0x368   : > { %p26_p12 = scmp.ge.s32.totalorder %s2780_s24, 4   ;;  %s2784_s22 = smov %s2781_s14 }
 0x36a   :  { %28 = sbr.rel (!%p26_p12) target bundleno = 12 (0xc), region = 119 }
 0x371   :  { %1293 = vsyncpa [#allocation3], 1 }
 0x372   :  { %1295 = vsyncpa [#allocation3 + $0x1], 1 }
 0x373   :  { %1296 = vsyncpa [#allocation6], 1 }
 0x374   :  { %1298 = vsyncpa [#allocation6 + $0x1], 1 }
 0x375   :  { %1299 = vsyncpa [#allocation4], 1 }
 0x376   :  { %1301 = vsyncpa [#allocation4 + $0x1], 1 }
 0x377   :  { %1302 = vsyncpa [#allocation10], 1 }
 0x378   :  { %1304 = vsyncpa [#allocation10 + $0x1], 1 }

</bundles_post_ra>
